<compile_context>
chip_gen: v7x
topology: tpu7x:2x2x1
jax: 0.10.0
libtpu: 0.0.40
codegen_flags: <defaults>
</compile_context>

<pallas_src>
import math
import jax
import jax.numpy as jnp
from jax import lax
from jax.experimental import pallas as pl
from jax.experimental.pallas import tpu as pltpu

SEQ_LEN = 5
BATCH = 1
INPUT_SIZE = 4
HIDDEN_SIZE = 4


def rnn_kernel(x_ref, wih_t_ref, whh_ref, b_ref, out_ref):
    """Single-layer Elman RNN (tanh), h0 = 0, batch = 1.

    x_ref:     (seq_len, input_size)   VMEM  -- batch dim already squeezed
    wih_t_ref: (input_size, hidden)    VMEM  -- W_ih^T (transpose hoisted)
    whh_ref:   (hidden, hidden)        VMEM  -- W_hh (used un-transposed)
    b_ref:     (1, hidden)             VMEM  -- b_ih + b_hh folded
    out_ref:   (seq_len, hidden)       VMEM
    """
    seq_len, input_size = x_ref.shape
    hidden = whh_ref.shape[0]

    # ---- loop-invariant work, hoisted out of the recurrence ----------------
    whh = whh_ref[...]

    # xw[t, j] = sum_i x[t, i] * W_ih[j, i] + (b_ih + b_hh)[j]
    # Batched over all timesteps; done as `input_size` broadcast-FMAs on the
    # VPU (exact f32), entirely off the serial critical path.
    xw = jnp.broadcast_to(b_ref[...], (seq_len, hidden))
    for i in range(input_size):
        xw = xw + x_ref[:, i:i + 1] * wih_t_ref[i:i + 1, :]

    # Identity mask used to flip the (H, 1) recurrence result back into a
    # (1, H) row with a mul + sublane reduce (no transpose op, no MXU).
    rows = lax.broadcasted_iota(jnp.int32, (hidden, hidden), 0)
    cols = lax.broadcasted_iota(jnp.int32, (hidden, hidden), 1)
    eye = (rows == cols).astype(jnp.float32)

    # ---- serial recurrence, fully unrolled (seq_len is static) -------------
    h = jnp.zeros((1, hidden), jnp.float32)
    for t in range(seq_len):
        # (h @ W_hh^T) kept on the VPU/XLU:
        #   col[i] = sum_j h[j] * W_hh[i, j]   (lane reduce)
        #   row[j] = col[j]                    (eye mask + sublane reduce)
        col = jnp.sum(h * whh, axis=1, keepdims=True)     # (hidden, 1)
        row = jnp.sum(col * eye, axis=0, keepdims=True)   # (1, hidden)
        h = jnp.tanh(row + xw[t:t + 1, :])
        # Masked (1, hidden) store; off the serial dependency chain.
        out_ref[pl.ds(t, 1), :] = h


@jax.jit
def rnn_forward(x, w_ih, w_hh, b_ih, b_hh):
    """x: (seq_len, batch=1, input_size) -> (seq_len*batch, hidden_size)."""
    seq_len, batch, input_size = x.shape
    hidden = w_ih.shape[0]
    assert batch == 1, "kernel specialised for batch_size=1 (as in the spec)"

    x2d = x.reshape(seq_len * batch, input_size)      # (S, I)
    wih_t = w_ih.T                                    # transpose hoisted out of the loop
    bias = (b_ih + b_hh).reshape(1, hidden)           # biases folded once

    vmem = pl.BlockSpec(memory_space=pltpu.MemorySpace.VMEM)
    out = pl.pallas_call(
        rnn_kernel,
        out_shape=jax.ShapeDtypeStruct((seq_len * batch, hidden), jnp.float32),
        in_specs=[vmem, vmem, vmem, vmem],
        out_specs=vmem,
    )(x2d, wih_t, w_hh, bias)
    return out


def reference_rnn(x, w_ih, w_hh, b_ih, b_hh):
    """Pure-JAX reference matching torch.nn.RNN (tanh) forward, h0 = 0."""
    seq_len, batch, _ = x.shape
    hidden = w_ih.shape[0]
    hp = lax.Precision.HIGHEST
    h = jnp.zeros((batch, hidden), jnp.float32)
    outs = []
    for t in range(seq_len):
        pre = (jnp.dot(x[t], w_ih.T, precision=hp) + b_ih
               + jnp.dot(h, w_hh.T, precision=hp) + b_hh)
        h = jnp.tanh(pre)
        outs.append(h)
    return jnp.stack(outs).reshape(-1, hidden)


if __name__ == "__main__":
    # Dataset construction mirrors the PyTorch script (one-hot rows).
    datas = jnp.eye(4, dtype=jnp.float32)
    x_data = [1, 0, 2, 2, 3]
    inputs = jnp.stack([datas[i] for i in x_data]).reshape(SEQ_LEN, BATCH, INPUT_SIZE)

    # Deterministic params, same distribution as torch.nn.RNN:
    # uniform(-1/sqrt(hidden), 1/sqrt(hidden)).
    key = jax.random.PRNGKey(0)
    k1, k2, k3, k4 = jax.random.split(key, 4)
    bound = 1.0 / math.sqrt(HIDDEN_SIZE)
    w_ih = jax.random.uniform(k1, (HIDDEN_SIZE, INPUT_SIZE), jnp.float32, -bound, bound)
    w_hh = jax.random.uniform(k2, (HIDDEN_SIZE, HIDDEN_SIZE), jnp.float32, -bound, bound)
    b_ih = jax.random.uniform(k3, (HIDDEN_SIZE,), jnp.float32, -bound, bound)
    b_hh = jax.random.uniform(k4, (HIDDEN_SIZE,), jnp.float32, -bound, bound)

    out = rnn_forward(inputs, w_ih, w_hh, b_ih, b_hh)
    out = jax.block_until_ready(out)

    ref = reference_rnn(inputs, w_ih, w_hh, b_ih, b_hh)
    assert out.shape == (SEQ_LEN * BATCH, HIDDEN_SIZE), out.shape
    assert jnp.allclose(out, ref, atol=1e-4, rtol=1e-4), (out, ref)

    print("KERNEL_OK")
</pallas_src>

<mosaic_0001>
module attributes {stable_mosaic.version = 11 : i64} {
  func.func @rnn_kernel(%arg0: memref<5x4xf32, #tpu.memory_space<vmem>>, %arg1: memref<4x4xf32, #tpu.memory_space<vmem>>, %arg2: memref<4x4xf32, #tpu.memory_space<vmem>>, %arg3: memref<1x4xf32, #tpu.memory_space<vmem>>, %arg4: memref<5x4xf32, #tpu.memory_space<vmem>>) attributes {dimension_semantics = [], scalar_prefetch = 0 : i64, scratch_operands = 0 : i64, tpu.core_type = #tpu.core_type<tc>} {
    %c0 = arith.constant 0 : index
    %c0_0 = arith.constant 0 : index
    %0 = vector.load %arg2[%c0, %c0_0] : memref<4x4xf32, #tpu.memory_space<vmem>>, vector<4x4xf32>
    %c0_1 = arith.constant 0 : index
    %c0_2 = arith.constant 0 : index
    %1 = vector.load %arg3[%c0_1, %c0_2] : memref<1x4xf32, #tpu.memory_space<vmem>>, vector<1x4xf32>
    %2 = vector.shape_cast %1 : vector<1x4xf32> to vector<1x4xf32>
    %3 = vector.broadcast %2 : vector<1x4xf32> to vector<5x4xf32>
    %c0_3 = arith.constant 0 : index
    %c0_4 = arith.constant 0 : index
    %4 = vector.load %arg0[%c0_3, %c0_4] : memref<5x4xf32, #tpu.memory_space<vmem>>, vector<5x1xf32>
    %c0_5 = arith.constant 0 : index
    %c0_6 = arith.constant 0 : index
    %5 = vector.load %arg1[%c0_5, %c0_6] : memref<4x4xf32, #tpu.memory_space<vmem>>, vector<1x4xf32>
    %6 = vector.broadcast %4 : vector<5x1xf32> to vector<5x4xf32>
    %7 = vector.broadcast %5 : vector<1x4xf32> to vector<5x4xf32>
    %8 = arith.mulf %6, %7 : vector<5x4xf32>
    %9 = arith.addf %3, %8 : vector<5x4xf32>
    %c0_7 = arith.constant 0 : index
    %c1 = arith.constant 1 : index
    %10 = vector.load %arg0[%c0_7, %c1] : memref<5x4xf32, #tpu.memory_space<vmem>>, vector<5x1xf32>
    %c1_8 = arith.constant 1 : index
    %c0_9 = arith.constant 0 : index
    %11 = vector.load %arg1[%c1_8, %c0_9] : memref<4x4xf32, #tpu.memory_space<vmem>>, vector<1x4xf32>
    %12 = vector.broadcast %10 : vector<5x1xf32> to vector<5x4xf32>
    %13 = vector.broadcast %11 : vector<1x4xf32> to vector<5x4xf32>
    %14 = arith.mulf %12, %13 : vector<5x4xf32>
    %15 = arith.addf %9, %14 : vector<5x4xf32>
    %c0_10 = arith.constant 0 : index
    %c2 = arith.constant 2 : index
    %16 = vector.load %arg0[%c0_10, %c2] : memref<5x4xf32, #tpu.memory_space<vmem>>, vector<5x1xf32>
    %c2_11 = arith.constant 2 : index
    %c0_12 = arith.constant 0 : index
    %17 = vector.load %arg1[%c2_11, %c0_12] : memref<4x4xf32, #tpu.memory_space<vmem>>, vector<1x4xf32>
    %18 = vector.broadcast %16 : vector<5x1xf32> to vector<5x4xf32>
    %19 = vector.broadcast %17 : vector<1x4xf32> to vector<5x4xf32>
    %20 = arith.mulf %18, %19 : vector<5x4xf32>
    %21 = arith.addf %15, %20 : vector<5x4xf32>
    %c0_13 = arith.constant 0 : index
    %c3 = arith.constant 3 : index
    %22 = vector.load %arg0[%c0_13, %c3] : memref<5x4xf32, #tpu.memory_space<vmem>>, vector<5x1xf32>
    %c3_14 = arith.constant 3 : index
    %c0_15 = arith.constant 0 : index
    %23 = vector.load %arg1[%c3_14, %c0_15] : memref<4x4xf32, #tpu.memory_space<vmem>>, vector<1x4xf32>
    %24 = vector.broadcast %22 : vector<5x1xf32> to vector<5x4xf32>
    %25 = vector.broadcast %23 : vector<1x4xf32> to vector<5x4xf32>
    %26 = arith.mulf %24, %25 : vector<5x4xf32>
    %27 = arith.addf %21, %26 : vector<5x4xf32>
    %28 = tpu.iota {dimensions = array<i32: 0>} : vector<4x4xi32>
    %29 = tpu.iota {dimensions = array<i32: 1>} : vector<4x4xi32>
    %30 = arith.cmpi eq, %28, %29 : vector<4x4xi32>
    %31 = arith.extui %30 : vector<4x4xi1> to vector<4x4xi32>
    %32 = arith.sitofp %31 : vector<4x4xi32> to vector<4x4xf32>
    %cst = arith.constant 0.000000e+00 : f32
    %33 = vector.broadcast %cst : f32 to vector<1x4xf32>
    %34 = vector.broadcast %33 : vector<1x4xf32> to vector<4x4xf32>
    %35 = arith.mulf %34, %0 : vector<4x4xf32>
    %cst_16 = arith.constant dense<0.000000e+00> : vector<4xf32>
    %36 = vector.multi_reduction <add>, %35, %cst_16 [1] : vector<4x4xf32> to vector<4xf32>
    %37 = vector.shape_cast %36 : vector<4xf32> to vector<4x1xf32>
    %38 = vector.broadcast %37 : vector<4x1xf32> to vector<4x4xf32>
    %39 = arith.mulf %38, %32 : vector<4x4xf32>
    %cst_17 = arith.constant dense<0.000000e+00> : vector<4xf32>
    %40 = vector.multi_reduction <add>, %39, %cst_17 [0] : vector<4x4xf32> to vector<4xf32>
    %41 = vector.shape_cast %40 : vector<4xf32> to vector<1x4xf32>
    %42 = vector.extract_strided_slice %27 {offsets = [0, 0], sizes = [1, 4], strides = [1, 1]} : vector<5x4xf32> to vector<1x4xf32>
    %43 = arith.addf %41, %42 : vector<1x4xf32>
    %44 = math.tanh %43 : vector<1x4xf32>
    %c0_18 = arith.constant 0 : index
    %c0_19 = arith.constant 0 : index
    %45 = vector.load %arg4[%c0_18, %c0_19] : memref<5x4xf32, #tpu.memory_space<vmem>>, vector<1x4xf32>
    tpu.vector_store %arg4[%c0_18, %c0_19], %44 {strides = array<i32>} : memref<5x4xf32, #tpu.memory_space<vmem>>, vector<1x4xf32>,
    %46 = vector.broadcast %44 : vector<1x4xf32> to vector<4x4xf32>
    %47 = arith.mulf %46, %0 : vector<4x4xf32>
    %cst_20 = arith.constant dense<0.000000e+00> : vector<4xf32>
    %48 = vector.multi_reduction <add>, %47, %cst_20 [1] : vector<4x4xf32> to vector<4xf32>
    %49 = vector.shape_cast %48 : vector<4xf32> to vector<4x1xf32>
    %50 = vector.broadcast %49 : vector<4x1xf32> to vector<4x4xf32>
    %51 = arith.mulf %50, %32 : vector<4x4xf32>
    %cst_21 = arith.constant dense<0.000000e+00> : vector<4xf32>
    %52 = vector.multi_reduction <add>, %51, %cst_21 [0] : vector<4x4xf32> to vector<4xf32>
    %53 = vector.shape_cast %52 : vector<4xf32> to vector<1x4xf32>
    %54 = vector.extract_strided_slice %27 {offsets = [1, 0], sizes = [1, 4], strides = [1, 1]} : vector<5x4xf32> to vector<1x4xf32>
    %55 = arith.addf %53, %54 : vector<1x4xf32>
    %56 = math.tanh %55 : vector<1x4xf32>
    %c1_22 = arith.constant 1 : index
    %c0_23 = arith.constant 0 : index
    %57 = vector.load %arg4[%c1_22, %c0_23] : memref<5x4xf32, #tpu.memory_space<vmem>>, vector<1x4xf32>
    tpu.vector_store %arg4[%c1_22, %c0_23], %56 {strides = array<i32>} : memref<5x4xf32, #tpu.memory_space<vmem>>, vector<1x4xf32>,
    %58 = vector.broadcast %56 : vector<1x4xf32> to vector<4x4xf32>
    %59 = arith.mulf %58, %0 : vector<4x4xf32>
    %cst_24 = arith.constant dense<0.000000e+00> : vector<4xf32>
    %60 = vector.multi_reduction <add>, %59, %cst_24 [1] : vector<4x4xf32> to vector<4xf32>
    %61 = vector.shape_cast %60 : vector<4xf32> to vector<4x1xf32>
    %62 = vector.broadcast %61 : vector<4x1xf32> to vector<4x4xf32>
    %63 = arith.mulf %62, %32 : vector<4x4xf32>
    %cst_25 = arith.constant dense<0.000000e+00> : vector<4xf32>
    %64 = vector.multi_reduction <add>, %63, %cst_25 [0] : vector<4x4xf32> to vector<4xf32>
    %65 = vector.shape_cast %64 : vector<4xf32> to vector<1x4xf32>
    %66 = vector.extract_strided_slice %27 {offsets = [2, 0], sizes = [1, 4], strides = [1, 1]} : vector<5x4xf32> to vector<1x4xf32>
    %67 = arith.addf %65, %66 : vector<1x4xf32>
    %68 = math.tanh %67 : vector<1x4xf32>
    %c2_26 = arith.constant 2 : index
    %c0_27 = arith.constant 0 : index
    %69 = vector.load %arg4[%c2_26, %c0_27] : memref<5x4xf32, #tpu.memory_space<vmem>>, vector<1x4xf32>
    tpu.vector_store %arg4[%c2_26, %c0_27], %68 {strides = array<i32>} : memref<5x4xf32, #tpu.memory_space<vmem>>, vector<1x4xf32>,
    %70 = vector.broadcast %68 : vector<1x4xf32> to vector<4x4xf32>
    %71 = arith.mulf %70, %0 : vector<4x4xf32>
    %cst_28 = arith.constant dense<0.000000e+00> : vector<4xf32>
    %72 = vector.multi_reduction <add>, %71, %cst_28 [1] : vector<4x4xf32> to vector<4xf32>
    %73 = vector.shape_cast %72 : vector<4xf32> to vector<4x1xf32>
    %74 = vector.broadcast %73 : vector<4x1xf32> to vector<4x4xf32>
    %75 = arith.mulf %74, %32 : vector<4x4xf32>
    %cst_29 = arith.constant dense<0.000000e+00> : vector<4xf32>
    %76 = vector.multi_reduction <add>, %75, %cst_29 [0] : vector<4x4xf32> to vector<4xf32>
    %77 = vector.shape_cast %76 : vector<4xf32> to vector<1x4xf32>
    %78 = vector.extract_strided_slice %27 {offsets = [3, 0], sizes = [1, 4], strides = [1, 1]} : vector<5x4xf32> to vector<1x4xf32>
    %79 = arith.addf %77, %78 : vector<1x4xf32>
    %80 = math.tanh %79 : vector<1x4xf32>
    %c3_30 = arith.constant 3 : index
    %c0_31 = arith.constant 0 : index
    %81 = vector.load %arg4[%c3_30, %c0_31] : memref<5x4xf32, #tpu.memory_space<vmem>>, vector<1x4xf32>
    tpu.vector_store %arg4[%c3_30, %c0_31], %80 {strides = array<i32>} : memref<5x4xf32, #tpu.memory_space<vmem>>, vector<1x4xf32>,
    %82 = vector.broadcast %80 : vector<1x4xf32> to vector<4x4xf32>
    %83 = arith.mulf %82, %0 : vector<4x4xf32>
    %cst_32 = arith.constant dense<0.000000e+00> : vector<4xf32>
    %84 = vector.multi_reduction <add>, %83, %cst_32 [1] : vector<4x4xf32> to vector<4xf32>
    %85 = vector.shape_cast %84 : vector<4xf32> to vector<4x1xf32>
    %86 = vector.broadcast %85 : vector<4x1xf32> to vector<4x4xf32>
    %87 = arith.mulf %86, %32 : vector<4x4xf32>
    %cst_33 = arith.constant dense<0.000000e+00> : vector<4xf32>
    %88 = vector.multi_reduction <add>, %87, %cst_33 [0] : vector<4x4xf32> to vector<4xf32>
    %89 = vector.shape_cast %88 : vector<4xf32> to vector<1x4xf32>
    %90 = vector.extract_strided_slice %27 {offsets = [4, 0], sizes = [1, 4], strides = [1, 1]} : vector<5x4xf32> to vector<1x4xf32>
    %91 = arith.addf %89, %90 : vector<1x4xf32>
    %92 = math.tanh %91 : vector<1x4xf32>
    %c4 = arith.constant 4 : index
    %c0_34 = arith.constant 0 : index
    %93 = vector.load %arg4[%c4, %c0_34] : memref<5x4xf32, #tpu.memory_space<vmem>>, vector<1x4xf32>
    tpu.vector_store %arg4[%c4, %c0_34], %92 {strides = array<i32>} : memref<5x4xf32, #tpu.memory_space<vmem>>, vector<1x4xf32>,
    return
  }
}

</mosaic_0001>

<bundles_post_ra>
// kernel: rnn_forward.1
= control target key start
LH: loop header
LB: loop body
LE: loop exit
PB: predicated region body
PF: predicated region fallthrough
CT: control target
= control target key end

     0   :  { %vm79_vm0 = vcmask 27648   ;;  %v205_v1 = vmov 1   ;;  %v206_v3 = vmov 0   ;;  %v207_v6 = vmov 2   ;;  %s309_s2 = inlined_call_operand.vmem [shape: f32[4,4], index: 2, kind: input, shape index: {}]   ;;  %s310_s0 = inlined_call_operand.vmem [shape: f32[5,4], index: 0, kind: input, shape index: {}]   ;;  %s311_s1 = inlined_call_operand.vmem [shape: f32[4,4], index: 1, kind: input, shape index: {}]   ;;  %s312_s3 = inlined_call_operand.vmem [shape: f32[1,4], index: 3, kind: input, shape index: {}]   ;;  %s313_s4 = inlined_call_operand.vmem [shape: f32[5,4], index: 4, kind: output, shape index: {}]  }
   0x1   :  { %v238_v0 = vld [vmem:[%s309_s2] sm:$0xf]  ;;  %191 = vset.pattern.permute.xlu1 %v205_v1  ;;  %190 = vset.pattern.permute.xlu0 %v206_v3  ;;  %v208_v7 = vmov 3   ;;  %v71_v8 = vlaneseq  ;;  %v209_v11 = vmov 0.0   ;;  %vm93_vm2 = vcmask 24576  }
   0x2   :  { %v25_v2 = vld [vmem:[%s310_s0] sm:$0x1f]  ;;  %v78_v4 = vmul.f32 0.0, %v238_v0  ;;  %vm113_vm3 = vcmask 25601   ;;  %vm133_vm4 = vcmask 26626   ;;  %vm153_vm5 = vcmask 27651  }
   0x3   :  { %40 = vperm.xlu1 %191, %v25_v2   ;;  %v245_v9 = vshrl.u32 %v71_v8, 7  ;;  %v74_v10 = vand.u32 127, %v71_v8  ;;  %v180_v20 = vld [vmem:[%s311_s1] ss:$0 sm:$0xff]  ;;  %v181_v22 = vld [vmem:[%s311_s1 + $0x1] ss:$0 sm:$0xff] }
   0x4   :  { %v80_v5 = vsel %vm79_vm0, %v78_v4, 0.0  ;;  %v179_v23 = vld [vmem:[%s312_s3] ss:$0 sm:$0xff]  ;;  %v182_v27 = vld [vmem:[%s311_s1 + $0x2] ss:$0 sm:$0xff]  ;;  %vm173_vm6 = vcmask 28676  }
   0x5   :  { %81 = vadd.xlane.f32.xlu0 %v80_v5  ;;  %vm75_vm1 = vcmp.eq.s32.totalorder %v245_v9, %v74_v10  ;;  %v183_v28 = vld [vmem:[%s311_s1 + $0x3] ss:$0 sm:$0xff]  ;;  %v97_v40 = vsub.s32 0, %v245_v9  ;;  %v117_v55 = vsub.s32 1, %v245_v9 }
   0x6   :  { %v248_v12 = vsel %vm75_vm1, 1.0, %v209_v11 }
   0x7   :  { %192 = vset.pattern.permute.xlu1 %v207_v6 }
   0x8   :  { %51 = vperm.xlu1 %192, %v25_v2  }
   0xc   :  { %193 = vset.pattern.permute.xlu1 %v208_v7 }
   0xd   :  { %62 = vperm.xlu1 %193, %v25_v2  }
  0x1b   :  { %29 = vperm.xlu0 %190, %v25_v2  }
  0x1f   :  { %194 = vset.pattern.permute.xlu0 %v208_v7  ;;  %v137_v7 = vsub.s32 2, %v245_v9 }
  0x82   :  { %v41_v13 = vpop.permute.xlu1 %40 }
  0x83   :  { %v47_v30 = vmul.f32 %v181_v22, %v41_v13 }
  0x87   :  { %v52_v18 = vpop.permute.xlu1 %51 }
  0x88   :  { %v58_v34 = vmul.f32 %v182_v27, %v52_v18 }
  0x8c   :  { %v63_v29 = vpop.permute.xlu1 %62 }
  0x8d   :  { %v69_v35 = vmul.f32 %v183_v28, %v63_v29 }
  0x92   :  { %v82_v14 = vpop.xlane.xlu0 %81 }
  0x93   :  { %v83_v15 = vmul.f32 %v248_v12, %v82_v14 }
  0x95   :  { %v84_v16 = vsel %vm79_vm0, %v83_v15, 0.0 }
  0x96   :  { %v85_v17 = vrot.slane %v84_v16, 4 }
  0x98   :  { %v86_v19 = vadd.f32 %v85_v17, %v84_v16 }
  0x9a   :  { %v87_v21 = vrot.slane %v86_v19, 2  ;;  %v30_v24 = vpop.permute.xlu0 %29 }
  0x9b   :  { %v36_v25 = vmul.f32 %v180_v20, %v30_v24  ;;  %v157_v24 = vsub.s32 3, %v245_v9 }
  0x9c   :  { %v88_v26 = vadd.f32 %v87_v21, %v86_v19 }
  0x9d   :  { %v37_v31 = vadd.f32 %v179_v23, %v36_v25 }
  0x9e   :  { %v89_v32 = vrot.slane %v88_v26, 1 }
  0x9f   :  { %v48_v33 = vadd.f32 %v47_v30, %v37_v31 }
  0xa0   :  { %v90_v37 = vadd.f32 %v89_v32, %v88_v26 }
  0xa1   :  { %v59_v36 = vadd.f32 %v58_v34, %v48_v33 }
  0xa3   :  { %v267_v38 = vadd.f32 %v69_v35, %v59_v36 }
  0xa5   :  { %v91_v39 = vadd.f32 %v90_v37, %v267_v38 }
  0xa7   :  { %195 = vtanh.f32 %v91_v39 }
  0xb1   :  { %v196_v41 = vpop.eup %195 }
  0xb2   :  { %v98_v42 = vrot.slane %v196_v41, %v97_v40  ;;  %94 = vst.msk [vmem:[%s313_s4] sm:$0x1] %vm93_vm2, %v196_v41 }
  0xb4   :  { %v99_v43 = vmul.f32 %v98_v42, %v238_v0 }
  0xb6   :  { %v100_v44 = vsel %vm79_vm0, %v99_v43, 0.0 }
  0xb7   :  { %101 = vadd.xlane.f32.xlu1 %v100_v44 }
 0x144   :  { %v102_v45 = vpop.xlane.xlu1 %101 }
 0x145   :  { %v103_v46 = vmul.f32 %v248_v12, %v102_v45 }
 0x147   :  { %v104_v47 = vsel %vm79_vm0, %v103_v46, 0.0 }
 0x148   :  { %v105_v48 = vrot.slane %v104_v47, 4 }
 0x14a   :  { %v106_v49 = vadd.f32 %v105_v48, %v104_v47 }
 0x14c   :  { %v107_v50 = vrot.slane %v106_v49, 2 }
 0x14e   :  { %v108_v51 = vadd.f32 %v107_v50, %v106_v49 }
 0x150   :  { %v109_v52 = vrot.slane %v108_v51, 1 }
 0x152   :  { %v110_v53 = vadd.f32 %v109_v52, %v108_v51 }
 0x154   :  { %v111_v54 = vadd.f32 %v110_v53, %v267_v38 }
 0x156   :  { %197 = vtanh.f32 %v111_v54 }
 0x160   :  { %v198_v56 = vpop.eup %197 }
 0x161   :  { %114 = vst.msk [vmem:[%s313_s4] sm:$0x2] %vm113_vm3, %v198_v56  ;;  %v118_v57 = vrot.slane %v198_v56, %v117_v55 }
 0x163   :  { %v119_v58 = vmul.f32 %v118_v57, %v238_v0 }
 0x165   :  { %v120_v59 = vsel %vm79_vm0, %v119_v58, 0.0 }
 0x166   :  { %121 = vadd.xlane.f32.xlu0 %v120_v59 }
 0x1f3   :  { %v122_v60 = vpop.xlane.xlu0 %121 }
 0x1f4   :  { %v123_v61 = vmul.f32 %v248_v12, %v122_v60 }
 0x1f6   :  { %v124_v62 = vsel %vm79_vm0, %v123_v61, 0.0 }
 0x1f7   :  { %v125_v63 = vrot.slane %v124_v62, 4 }
 0x1f9   :  { %v126_v1 = vadd.f32 %v125_v63, %v124_v62 }
 0x1fb   :  { %v127_v2 = vrot.slane %v126_v1, 2 }
 0x1fd   :  { %v128_v3 = vadd.f32 %v127_v2, %v126_v1 }
 0x1ff   :  { %v129_v4 = vrot.slane %v128_v3, 1 }
 0x201   :  { %v130_v5 = vadd.f32 %v129_v4, %v128_v3 }
 0x203   :  { %v131_v6 = vadd.f32 %v130_v5, %v267_v38 }
 0x205   :  { %199 = vtanh.f32 %v131_v6 }
 0x20f   :  { %v200_v8 = vpop.eup %199 }
 0x210   :  { %134 = vst.msk [vmem:[%s313_s4] sm:$0x4] %vm133_vm4, %v200_v8  ;;  %v138_v10 = vrot.slane %v200_v8, %v137_v7 }
 0x212   :  { %v139_v11 = vmul.f32 %v138_v10, %v238_v0 }
 0x214   :  { %v140_v13 = vsel %vm79_vm0, %v139_v11, 0.0 }
 0x215   :  { %141 = vadd.xlane.f32.xlu1 %v140_v13 }
 0x2a2   :  { %v142_v14 = vpop.xlane.xlu1 %141 }
 0x2a3   :  { %v143_v15 = vmul.f32 %v248_v12, %v142_v14 }
 0x2a5   :  { %v144_v16 = vsel %vm79_vm0, %v143_v15, 0.0 }
 0x2a6   :  { %v145_v17 = vrot.slane %v144_v16, 4 }
 0x2a8   :  { %v146_v18 = vadd.f32 %v145_v17, %v144_v16 }
 0x2aa   :  { %v147_v19 = vrot.slane %v146_v18, 2 }
 0x2ac   :  { %v148_v20 = vadd.f32 %v147_v19, %v146_v18 }
 0x2ae   :  { %v149_v21 = vrot.slane %v148_v20, 1 }
 0x2b0   :  { %v150_v22 = vadd.f32 %v149_v21, %v148_v20 }
 0x2b2   :  { %v151_v23 = vadd.f32 %v150_v22, %v267_v38 }
 0x2b4   :  { %201 = vtanh.f32 %v151_v23 }
 0x2be   :  { %v202_v25 = vpop.eup %201 }
 0x2bf   :  { %154 = vst.msk [vmem:[%s313_s4] sm:$0x8] %vm153_vm5, %v202_v25  ;;  %v158_v26 = vrot.slane %v202_v25, %v157_v24 }
 0x2c1   :  { %v159_v27 = vmul.f32 %v158_v26, %v238_v0 }
 0x2c3   :  { %v160_v28 = vsel %vm79_vm0, %v159_v27, 0.0 }
 0x2c4   :  { %161 = vadd.xlane.f32.xlu1 %v160_v28 }
 0x351   :  { %v162_v29 = vpop.xlane.xlu1 %161 }
 0x352   :  { %v163_v30 = vmul.f32 %v248_v12, %v162_v29 }
 0x354   :  { %v164_v31 = vsel %vm79_vm0, %v163_v30, 0.0 }
 0x355   :  { %v165_v32 = vrot.slane %v164_v31, 4 }
 0x357   :  { %v166_v33 = vadd.f32 %v165_v32, %v164_v31 }
 0x359   :  { %v167_v9 = vrot.slane %v166_v33, 2 }
 0x35b   :  { %v168_v34 = vadd.f32 %v167_v9, %v166_v33 }
 0x35d   :  { %v169_v35 = vrot.slane %v168_v34, 1 }
 0x35f   :  { %v170_v36 = vadd.f32 %v169_v35, %v168_v34 }
 0x361   :  { %v171_v37 = vadd.f32 %v170_v36, %v267_v38 }
 0x363   :  { %203 = vtanh.f32 %v171_v37 }
 0x36d   :  { %v204_v39 = vpop.eup %203 }
 0x36e   :  { %174 = vst.msk [vmem:[%s313_s4] sm:$0x10] %vm173_vm6, %v204_v39 }

</bundles_post_ra>
